<compile_context>
chip_gen: v5e
topology: v5e:2x2
jax: 0.10.0
libtpu: 0.0.40
codegen_flags: <defaults>
</compile_context>

<pallas_src>
import jax
import jax.numpy as jnp
from jax.experimental import pallas as pl
from jax.experimental.pallas import tpu as pltpu

LANE = 128
_TARGET_TILE_BYTES = 1 << 20  # ~1 MiB per buffer: good pipeline overlap, tiny per-step cost


# ----------------------------- Pallas kernel -------------------------------

def _scale_kernel(x_ref, s_ref, o_ref):
    # x_ref: (tm, tn) tile of the flattened (N*C, HW_pad) tensor.
    # s_ref: (tm, 1)  per-row scale (per-channel scale replicated over batch).
    # Lane broadcast of the (tm, 1) column is free on the VPU; stores are lane-dense.
    o_ref[...] = x_ref[...] * s_ref[...]


# ----------------------------- tiling helpers --------------------------------

def _vmem_budget_bytes():
    """Generation-aware VMEM budget (quarter of physical: 32 MiB v5e/v6e, 16 MiB v7x)."""
    try:
        cap = pltpu.get_tpu_info().vmem_capacity_bytes
    except Exception:
        cap = 64 << 20  # conservative fallback (v7x physical size)
    return cap // 4


def _pick_tiles(rows, hw_pad, dtype, vmem_budget):
    """Pick (tm, tn) row/lane tile sizes.

    Goals: lane-dense tiles, ~1 MiB per buffer for pipelining, >= 4 grid steps
    when the row count allows it (feeds both v7x TensorCores), and total VMEM
    (x + out + lane-padded scale, each double-buffered) within the budget.
    """
    itemsize = jnp.dtype(dtype).itemsize
    sub = 32 // itemsize  # sublane pack: 8 (f32) / 16 (bf16) / 32 (int8)

    # Lane tile: keep whole (padded) rows when small, otherwise split into
    # multiples of 128 so a minimal (sub, tn) tile stays near the target size.
    if hw_pad * itemsize * sub <= 2 * _TARGET_TILE_BYTES:
        tn = hw_pad
    else:
        tn = max(LANE, (_TARGET_TILE_BYTES // (sub * itemsize)) // LANE * LANE)

    if rows <= sub:
        # Fewer rows than one sublane pack: full-dim escape hatch, nothing to split.
        return rows, tn

    # Row tile from the per-buffer size target.
    tm = max(sub, (_TARGET_TILE_BYTES // (tn * itemsize)) // sub * sub)
    # Cap by the VMEM budget: x + out tiles plus the lane-padded (tm, 1) scale
    # tile, each double-buffered by the BlockSpec pipeline.
    per_row_bytes = 2 * (2 * tn + LANE) * itemsize
    tm = min(tm, max(sub, (vmem_budget // per_row_bytes) // sub * sub))
    # Keep >= 4 grid steps so DMA/compute overlap and (on v7x) row blocks shard
    # across both TensorCores.  On v5e/v6e extra steps cost only ~0.35 us each.
    tm = min(tm, max(sub, (pl.cdiv(rows, 4) // sub) * sub))
    return tm, tn


# ----------------------------- wrapper --------------------------------------

def learnable_scale_per_channel(x_nchw, scale, *, donate_x=False):
    """x_nchw: (N, C, H, W); scale: (1, C, 1, 1) or (C,).  Returns x * scale."""
    N, C, H, W = x_nchw.shape
    HW = H * W
    rows = N * C
    dtype = x_nchw.dtype

    # Flatten NCHW -> (rows, HW): pure reshape (row index = n*C + c), no transpose.
    x2d = x_nchw.reshape(rows, HW)

    # Pad the lane axis up to a multiple of 128 so all stores are lane-dense.
    hw_pad = pl.cdiv(HW, LANE) * LANE
    if hw_pad != HW:
        x2d = jnp.pad(x2d, ((0, 0), (0, hw_pad - HW)))

    # Per-row scale in the compute dtype (matches row index n*C + c).
    s_rows = jnp.tile(scale.reshape(C).astype(dtype), N).reshape(rows, 1)

    vmem_budget = _vmem_budget_bytes()
    tm, tn = _pick_tiles(rows, hw_pad, dtype, vmem_budget)
    grid = (pl.cdiv(rows, tm), pl.cdiv(hw_pad, tn))

    out2d = pl.pallas_call(
        _scale_kernel,
        out_shape=jax.ShapeDtypeStruct((rows, hw_pad), dtype),
        grid_spec=pltpu.PrefetchScalarGridSpec(
            num_scalar_prefetch=0,
            grid=grid,
            in_specs=[
                pl.BlockSpec((tm, tn), lambda i, j: (i, j)),
                pl.BlockSpec((tm, 1), lambda i, j: (i, 0)),
            ],
            out_specs=pl.BlockSpec((tm, tn), lambda i, j: (i, j)),
        ),
        compiler_params=pltpu.CompilerParams(
            dimension_semantics=("parallel", "parallel"),
            vmem_limit_bytes=vmem_budget,
        ),
        # Inference-only footprint win (x cannot be retained for backward then).
        input_output_aliases=({0: 0} if donate_x else {}),
    )(x2d, s_rows)

    if hw_pad != HW:
        out2d = out2d[:, :HW]
    return out2d.reshape(N, C, H, W)


# ----------------------------- pure-JAX reference ---------------------------

def _ref_forward(x, scale):
    return x * scale.reshape(1, -1, 1, 1).astype(x.dtype)


# ---------------------------------- main -------------------------------------

if __name__ == "__main__":
    N, C, H, W = 2, 4, 16, 16

    key = jax.random.PRNGKey(0)
    k_x, k_s = jax.random.split(key, 2)

    x = jax.random.normal(k_x, (N, C, H, W), dtype=jnp.float32)
    # PyTorch init is ones; perturb so the test is non-trivial.
    scale = (jnp.ones((1, C, 1, 1), jnp.float32)
             + 0.1 * jax.random.normal(k_s, (1, C, 1, 1), jnp.float32))

    out = jax.block_until_ready(learnable_scale_per_channel(x, scale))
    assert out.shape == (N, C, H, W), out.shape

    ref = jax.block_until_ready(_ref_forward(x, scale))
    assert jnp.allclose(out, ref, atol=1e-6, rtol=1e-6), \
        float(jnp.max(jnp.abs(out - ref)))

    # TODO(synk): scale is a trainable nn.Parameter in PyTorch; a custom_vjp around
    # this pallas_call would be needed for gradients (forward-only here).
    print("KERNEL_OK")
</pallas_src>

<mosaic_0001>
module attributes {stable_mosaic.version = 11 : i64} {
  func.func @_scale_kernel(%arg0: i32, %arg1: i32, %arg2: memref<8x256xf32, #tpu.memory_space<vmem>>, %arg3: memref<8x1xf32, #tpu.memory_space<vmem>>, %arg4: memref<8x256xf32, #tpu.memory_space<vmem>>) attributes {dimension_semantics = [#tpu.dimension_semantics<parallel>, #tpu.dimension_semantics<parallel>], iteration_bounds = array<i64: 1, 1>, scalar_prefetch = 0 : i64, scratch_operands = 0 : i64, tpu.core_type = #tpu.core_type<tc>, window_params = [{transform_indices = @transform_0, window_bounds = array<i64: 8, 256>}, {transform_indices = @transform_1, window_bounds = array<i64: 8, 1>}, {transform_indices = @transform_2, window_bounds = array<i64: 8, 256>}]} {
    %c0 = arith.constant 0 : index
    %c0_0 = arith.constant 0 : index
    %0 = vector.load %arg2[%c0, %c0_0] : memref<8x256xf32, #tpu.memory_space<vmem>>, vector<8x256xf32>
    %c0_1 = arith.constant 0 : index
    %c0_2 = arith.constant 0 : index
    %1 = vector.load %arg3[%c0_1, %c0_2] : memref<8x1xf32, #tpu.memory_space<vmem>>, vector<8x1xf32>
    %2 = vector.broadcast %1 : vector<8x1xf32> to vector<8x256xf32>
    %3 = arith.mulf %0, %2 : vector<8x256xf32>
    %c0_3 = arith.constant 0 : index
    %c0_4 = arith.constant 0 : index
    %4 = vector.load %arg4[%c0_3, %c0_4] : memref<8x256xf32, #tpu.memory_space<vmem>>, vector<8x256xf32>
    tpu.vector_store %arg4[%c0_3, %c0_4], %3 {strides = array<i32>} : memref<8x256xf32, #tpu.memory_space<vmem>>, vector<8x256xf32>,
    return
  }
  func.func @transform_0(%arg0: i32, %arg1: i32) -> (i32, i32) {
    %c0_i32 = arith.constant 0 : i32
    return %arg0, %arg1 : i32, i32
  }
  func.func @transform_1(%arg0: i32, %arg1: i32) -> (i32, i32) {
    %c0_i32 = arith.constant 0 : i32
    %c0_i32_0 = arith.constant 0 : i32
    return %arg0, %c0_i32 : i32, i32
  }
  func.func @transform_2(%arg0: i32, %arg1: i32) -> (i32, i32) {
    %c0_i32 = arith.constant 0 : i32
    return %arg0, %arg1 : i32, i32
  }
}

</mosaic_0001>

<bundles_post_ra>
// kernel: tpu_custom_call.1
= control target key start
LH: loop header
LB: loop body
LE: loop exit
PB: predicated region body
PF: predicated region fallthrough
CT: control target
= control target key end

     0   :  { %7 = vsyncpa [#allocation3], 0  ;;  %s138_s0 = inlined_call_operand.hbm [shape: f32[8,256], index: 0, kind: input, shape index: {}]   ;;  %s139_s1 = inlined_call_operand.vmem [shape: f32[8,1], index: 1, kind: input, shape index: {}]   ;;  %s140_s2 = inlined_call_operand.hbm [shape: f32[8,256], index: 2, kind: output, shape index: {}]  }
   0x1   :  { %8 = vsyncpa [#allocation4], 0  ;;  %s14_s11 = sshll.u32 %s138_s0, 4  ;;  %s111_s12 = smov [#allocation2]   ;;  %s15_s11 = int_to_ptr.hbm [resolvable:$true] %s14_s11 }
   0x2   :  { %s16_s13 = sshll.u32 %s111_s12, 4  ;;  %s17_s13 = int_to_ptr.vmem [resolvable:$true] %s16_s13 }
   0x3   :  { %19 = dma.hbm_to_vmem [thread:$0]  %s15_s11, 256, %s17_s13, [#allocation3]  }
   0x4   :  { %107 = dma.done.wait [#allocation3], 256  }
   0x5   :  { %108 = vsyncadd [#allocation3], 4294967040  ;;  %v112_v0 = vmov 0   ;;  %v28_v1 = vld [vmem:[%s139_s1] sm:$0xff]  ;;  %v27_v3 = vld [vmem:[#allocation2 + $0x8] sm:$0xff]  ;;  %s113_s16 = smov [#allocation5]  }
   0x6   :  { %58 = vset.pattern.permute.xlu0 %v112_v0  ;;  %v26_v2 = vld [vmem:[#allocation2] sm:$0xff]  ;;  %s43_s17 = sshll.u32 %s113_s16, 4  ;;  %s45_s19 = sshll.u32 %s140_s2, 4  ;;  %s44_s17 = int_to_ptr.vmem [resolvable:$true] %s43_s17  ;;  %s46_s19 = int_to_ptr.hbm [resolvable:$true] %s45_s19 }
   0x7   :  { %31 = vperm.xlu0 %58, %v28_v1  }
  0x79   :  { %v32_v4 = vpop.permute.xlu0 %31 }
  0x7a   :  { %v34_v5 = vmul.f32 %v32_v4, %v26_v2  ;;  %v35_v6 = vmul.f32 %v32_v4, %v27_v3 }
  0x7c   :  { %36 = vst [vmem:[#allocation5] sm:$0xff] %v34_v5 }
  0x7d   :  { %37 = vst [vmem:[#allocation5 + $0x8] sm:$0xff] %v35_v6 }
  0x7e   :  { %48 = dma.vmem_to_hbm [thread:$0]  %s44_s17, 256, %s46_s19, [#allocation4]  }
  0x7f   :  { %109 = dma.done.wait [#allocation4], 256  }
  0x80   :  { %110 = vsyncadd [#allocation4], 4294967040 }
  0x81   :  { %53 = vsyncpa [#allocation3], 1 }
  0x82   :  { %54 = vsyncpa [#allocation4], 1 }

</bundles_post_ra>
